<compile_context>
chip_gen: v5e
topology: v5e:2x2
jax: 0.10.0
libtpu: 0.0.40
codegen_flags: <defaults>
</compile_context>

<pallas_src>
import jax
import jax.numpy as jnp
from jax.experimental import pallas as pl
from jax.experimental.pallas import tpu as pltpu


def _round_up(x, m):
    return (x + m - 1) // m * m


# Conservative per-kernel VMEM budget for streamed blocks (v5e's default scoped
# limit is 16 MiB; leave headroom for resident weights / state / gate scratch).
_VMEM_BUDGET = 8 << 20


def _chunk_vmem_bytes(chunk, bb, fin, h):
    x_blk = 2 * chunk * bb * fin * 2      # bf16 x chunk, double-buffered
    o_blk = 2 * chunk * bb * h * 2        # bf16 hidden-seq chunk, double-buffered
    gx = chunk * bb * 4 * h * 4           # f32 gate-slab VMEM scratch
    return x_blk + o_blk + gx


def _pick_chunk(T, bb, fin, h, max_chunk=32):
    """Pick (chunk, padded_T).  Prefer an exact divisor of T; otherwise pad T up
    to a chunk multiple (padded timesteps are masked in-kernel).  Cap the chunk
    so the double-buffered working set fits the VMEM budget."""
    c = max(1, min(T, max_chunk))
    while c > 1 and _chunk_vmem_bytes(c, bb, fin, h) > _VMEM_BUDGET:
        c //= 2
    for d in range(c, 0, -1):             # good divisor -> no masked steps
        if T % d == 0 and 2 * d >= c:
            return d, T
    return c, _round_up(T, c)             # pad + mask (avoids chunk=1 cliff)


def _pick_batch_block(bp):
    """Two sublane-aligned batch blocks when possible so the leading 'parallel'
    grid axis can be sharded across v7x's two TensorCores."""
    if bp >= 16 and (bp // 2) % 8 == 0:
        return bp // 2
    return bp


def _unroll_for(chunk, H):
    # Full unroll while a step's gate tile is a handful of vregs; cap once H
    # grows (vreg pressure -> VMEM spills on the serial critical path).
    return True if H <= 128 else min(chunk, 8)


# ----------------------------------------------------------------------------
# LSTM cell math (f32; PyTorch gate order i, f, g, o).
# Full-lane transcendentals: EUP cost is per-vreg, so issue ONE sigmoid and ONE
# tanh over the whole (BB, 4H) gate tile, then slice the needed columns.
# ----------------------------------------------------------------------------
def _lstm_cell(gates, c_prev, H):
    sig = jax.nn.sigmoid(gates)
    tnh = jnp.tanh(gates)
    i = sig[:, 0 * H:1 * H]
    f = sig[:, 1 * H:2 * H]
    g = tnh[:, 2 * H:3 * H]
    o = sig[:, 3 * H:4 * H]
    c = f * c_prev + i * g
    h = o * jnp.tanh(c)
    return h, c


# ----------------------------------------------------------------------------
# Kernel A: recurrence for non-final layers (input projection fused).
# Grid = (batch blocks [parallel], time chunks [arbitrary]).
# ----------------------------------------------------------------------------
def _make_seq_kernel(seq_len, chunk, unroll):
    def kernel(x_ref, wih_ref, b_ref, whh_ref, hseq_ref, gx_scr, h_scr, c_scr):
        @pl.when(pl.program_id(1) == 0)
        def _():
            h_scr[...] = jnp.zeros_like(h_scr)
            c_scr[...] = jnp.zeros_like(c_scr)

        bb, H = h_scr.shape
        fin = x_ref.shape[-1]

        # Fused, hoisted input projection for the whole time chunk: one
        # MXU-friendly (chunk*bb, fin) @ (fin, 4H) dot, bias folded in; the
        # gate slab stays in VMEM (no HBM round trip).
        gx_scr[...] = jnp.dot(
            x_ref[...].reshape(chunk * bb, fin), wih_ref[...],
            preferred_element_type=jnp.float32) + b_ref[...]

        t0 = pl.program_id(1) * chunk

        def step(t, carry):
            h, c = carry
            row = pl.multiple_of(t * bb, bb)
            gates = gx_scr[pl.ds(row, bb), :] + jnp.dot(
                h.astype(jnp.bfloat16), whh_ref[...],
                preferred_element_type=jnp.float32)
            h_new, c_new = _lstm_cell(gates, c, H)
            if seq_len % chunk:           # padded (masked) timesteps: freeze state
                valid = (t0 + t) < seq_len
                h_new = jnp.where(valid, h_new, h)
                c_new = jnp.where(valid, c_new, c)
            hseq_ref[t] = h_new.astype(hseq_ref.dtype)
            return h_new, c_new

        h, c = jax.lax.fori_loop(0, chunk, step, (h_scr[...], c_scr[...]),
                                 unroll=unroll)
        h_scr[...] = h
        c_scr[...] = c

    return kernel


def lstm_layer_sequence(x, w_ih_t, w_hh_t, bias, *, chunk, batch_block, seq_len):
    Tp, Bp, Fin = x.shape
    H = w_hh_t.shape[0]
    G = 4 * H
    kernel = _make_seq_kernel(seq_len, chunk, _unroll_for(chunk, H))
    return pl.pallas_call(
        kernel,
        out_shape=jax.ShapeDtypeStruct((Tp, Bp, H), jnp.bfloat16),
        grid=(Bp // batch_block, Tp // chunk),
        in_specs=[
            pl.BlockSpec((chunk, batch_block, Fin), lambda b, c: (c, b, 0)),  # x chunk
            pl.BlockSpec((Fin, G), lambda b, c: (0, 0)),   # W_ih^T (resident)
            pl.BlockSpec((1, G), lambda b, c: (0, 0)),     # b_ih + b_hh (resident)
            pl.BlockSpec((H, G), lambda b, c: (0, 0)),     # W_hh^T (resident)
        ],
        out_specs=pl.BlockSpec((chunk, batch_block, H), lambda b, c: (c, b, 0)),
        scratch_shapes=[
            pltpu.VMEM((chunk * batch_block, G), jnp.float32),  # gate slab
            pltpu.VMEM((batch_block, H), jnp.float32),          # h state
            pltpu.VMEM((batch_block, H), jnp.float32),          # c state
        ],
        compiler_params=pltpu.CompilerParams(
            dimension_semantics=("parallel", "arbitrary")),
    )(x, w_ih_t, bias, w_hh_t)


# ----------------------------------------------------------------------------
# Kernel B: final layer recurrence with the Linear + Softmax head fused into
# the last-chunk epilogue.  Only (Bp, O) softmax probabilities leave VMEM.
# NOTE: out_ref relies on the constant-across-time output-block (accumulator)
# semantics; its index_map must stay independent of the time grid index.
# ----------------------------------------------------------------------------
def _make_final_kernel(seq_len, chunk, unroll):
    def kernel(x_ref, wih_ref, b_ref, whh_ref, wfc_ref, bfc_ref, out_ref,
               gx_scr, h_scr, c_scr):
        @pl.when(pl.program_id(1) == 0)
        def _():
            h_scr[...] = jnp.zeros_like(h_scr)
            c_scr[...] = jnp.zeros_like(c_scr)

        bb, H = h_scr.shape
        fin = x_ref.shape[-1]

        gx_scr[...] = jnp.dot(
            x_ref[...].reshape(chunk * bb, fin), wih_ref[...],
            preferred_element_type=jnp.float32) + b_ref[...]

        t0 = pl.program_id(1) * chunk

        def step(t, carry):
            h, c = carry
            row = pl.multiple_of(t * bb, bb)
            gates = gx_scr[pl.ds(row, bb), :] + jnp.dot(
                h.astype(jnp.bfloat16), whh_ref[...],
                preferred_element_type=jnp.float32)
            h_new, c_new = _lstm_cell(gates, c, H)
            if seq_len % chunk:
                valid = (t0 + t) < seq_len
                h_new = jnp.where(valid, h_new, h)
                c_new = jnp.where(valid, c_new, c)
            return h_new, c_new

        h, c = jax.lax.fori_loop(0, chunk, step, (h_scr[...], c_scr[...]),
                                 unroll=unroll)
        h_scr[...] = h
        c_scr[...] = c

        @pl.when(pl.program_id(1) == pl.num_programs(1) - 1)
        def _():
            logits = jnp.dot(h, wfc_ref[...],
                             preferred_element_type=jnp.float32) + bfc_ref[...]
            m = jnp.max(logits, axis=1, keepdims=True)
            e = jnp.exp(logits - m)
            out_ref[...] = e / jnp.sum(e, axis=1, keepdims=True)

    return kernel


def lstm_layer_final_with_head(x, w_ih_t, w_hh_t, bias, w_fc, b_fc, *,
                               chunk, batch_block, seq_len):
    Tp, Bp, Fin = x.shape
    H = w_hh_t.shape[0]
    G = 4 * H
    O = w_fc.shape[1]
    kernel = _make_final_kernel(seq_len, chunk, _unroll_for(chunk, H))
    return pl.pallas_call(
        kernel,
        out_shape=jax.ShapeDtypeStruct((Bp, O), jnp.float32),
        grid=(Bp // batch_block, Tp // chunk),
        in_specs=[
            pl.BlockSpec((chunk, batch_block, Fin), lambda b, c: (c, b, 0)),  # x chunk
            pl.BlockSpec((Fin, G), lambda b, c: (0, 0)),   # W_ih^T (resident)
            pl.BlockSpec((1, G), lambda b, c: (0, 0)),     # b_ih + b_hh
            pl.BlockSpec((H, G), lambda b, c: (0, 0)),     # W_hh^T (resident)
            pl.BlockSpec((H, O), lambda b, c: (0, 0)),     # fc weight
            pl.BlockSpec((1, O), lambda b, c: (0, 0)),     # fc bias
        ],
        out_specs=pl.BlockSpec((batch_block, O), lambda b, c: (b, 0)),
        scratch_shapes=[
            pltpu.VMEM((chunk * batch_block, G), jnp.float32),  # gate slab
            pltpu.VMEM((batch_block, H), jnp.float32),          # h state
            pltpu.VMEM((batch_block, H), jnp.float32),          # c state
        ],
        compiler_params=pltpu.CompilerParams(
            dimension_semantics=("parallel", "arbitrary")),
    )(x, w_ih_t, bias, w_hh_t, w_fc, b_fc)


# ----------------------------------------------------------------------------
# Full forward pass.
# ----------------------------------------------------------------------------
def lstm_classifier_forward(tokens, params, max_chunk=32):
    # Embedding gather is irregular; left to XLA outside the kernels (glue).
    emb = params["embedding"][tokens]                     # (B, T, E)
    B, T, E = emb.shape
    H = params["lstm"][0][1].shape[0]

    Bp = _round_up(B, 8)                                  # sublane-pad batch
    BB = _pick_batch_block(Bp)
    chunk, Tp = _pick_chunk(T, BB, max(E, H), H, max_chunk)

    x = jnp.transpose(emb, (1, 0, 2))                     # time-major (T, B, E)
    x = jnp.pad(x, ((0, Tp - T), (0, Bp - B), (0, 0)))
    layer_in = x.astype(jnp.bfloat16)                     # (Tp, Bp, E)

    num_layers = len(params["lstm"])
    probs = None
    for li, (w_ih_t, w_hh_t, bias) in enumerate(params["lstm"]):
        if li < num_layers - 1:
            layer_in = lstm_layer_sequence(
                layer_in, w_ih_t, w_hh_t, bias,
                chunk=chunk, batch_block=BB, seq_len=T)   # (Tp, Bp, H) bf16
            # TODO(synk): training-mode inter-layer dropout omitted (eval forward).
        else:
            probs = lstm_layer_final_with_head(
                layer_in, w_ih_t, w_hh_t, bias,
                params["fc_w"], params["fc_b"],
                chunk=chunk, batch_block=BB, seq_len=T)
    return probs[:B]


# ----------------------------------------------------------------------------
# Deterministic parameter init (shapes follow nn.Module __init__; weights are
# pre-transposed, LSTM matmul weights stored in bf16, biases pre-combined).
# ----------------------------------------------------------------------------
def init_params(key, vocab, E, H, O, num_layers=1):
    keys = iter(jax.random.split(key, 4 * num_layers + 4))
    params = {"embedding": jax.random.normal(next(keys), (vocab, E), jnp.float32)}

    scale = 1.0 / jnp.sqrt(jnp.float32(H))
    lstm = []
    in_dim = E
    for _ in range(num_layers):
        w_ih = jax.random.uniform(next(keys), (4 * H, in_dim), jnp.float32, -scale, scale)
        w_hh = jax.random.uniform(next(keys), (4 * H, H), jnp.float32, -scale, scale)
        b_ih = jax.random.uniform(next(keys), (4 * H,), jnp.float32, -scale, scale)
        b_hh = jax.random.uniform(next(keys), (4 * H,), jnp.float32, -scale, scale)
        lstm.append((w_ih.T.astype(jnp.bfloat16),
                     w_hh.T.astype(jnp.bfloat16),
                     (b_ih + b_hh).reshape(1, 4 * H)))
        in_dim = H
    params["lstm"] = lstm

    fc_scale = 1.0 / jnp.sqrt(jnp.float32(H))
    params["fc_w"] = jax.random.uniform(next(keys), (H, O), jnp.float32, -fc_scale, fc_scale)
    params["fc_b"] = jax.random.uniform(next(keys), (O,), jnp.float32,
                                        -fc_scale, fc_scale).reshape(1, O)
    return params


# ----------------------------------------------------------------------------
# Pure-JAX reference (same bf16-operand / f32-accumulation convention).
# ----------------------------------------------------------------------------
def reference_forward(tokens, params):
    emb = params["embedding"][tokens]
    x = jnp.transpose(emb, (1, 0, 2))                     # (T, B, E)
    B = x.shape[1]
    layer_in = x.astype(jnp.bfloat16)

    h_last = None
    for (w_ih_t, w_hh_t, b) in params["lstm"]:
        H = w_hh_t.shape[0]

        def step(carry, xt, w_ih_t=w_ih_t, w_hh_t=w_hh_t, b=b, H=H):
            h, c = carry
            gates = (jnp.dot(xt, w_ih_t, preferred_element_type=jnp.float32)
                     + jnp.dot(h.astype(jnp.bfloat16), w_hh_t,
                               preferred_element_type=jnp.float32)
                     + b)
            i = jax.nn.sigmoid(gates[:, :H])
            f = jax.nn.sigmoid(gates[:, H:2 * H])
            g = jnp.tanh(gates[:, 2 * H:3 * H])
            o = jax.nn.sigmoid(gates[:, 3 * H:])
            c = f * c + i * g
            h = o * jnp.tanh(c)
            return (h, c), h.astype(jnp.bfloat16)

        (h_last, _), hs = jax.lax.scan(
            step, (jnp.zeros((B, H), jnp.float32), jnp.zeros((B, H), jnp.float32)),
            layer_in)
        layer_in = hs

    logits = h_last @ params["fc_w"] + params["fc_b"]
    return jax.nn.softmax(logits, axis=1)


if __name__ == "__main__":
    B, T = 2, 8
    vocab, E, H, O = 50, 32, 32, 4

    key = jax.random.PRNGKey(0)
    pkey, tkey, p2key, p3key, t3key = jax.random.split(key, 5)
    tokens = jax.random.randint(tkey, (B, T), 0, vocab, dtype=jnp.int32)

    # Default configuration (num_layers=1), matching the nn.Module defaults.
    params1 = init_params(pkey, vocab, E, H, O, num_layers=1)
    out1 = jax.block_until_ready(lstm_classifier_forward(tokens, params1))
    ref1 = reference_forward(tokens, params1)
    assert out1.shape == (B, O), out1.shape
    assert jnp.allclose(out1, ref1, atol=1e-3, rtol=1e-3), (out1, ref1)

    # num_layers=2 exercises the intermediate-layer sequence kernel as well.
    params2 = init_params(p2key, vocab, E, H, O, num_layers=2)
    out2 = jax.block_until_ready(lstm_classifier_forward(tokens, params2))
    ref2 = reference_forward(tokens, params2)
    assert jnp.allclose(out2, ref2, atol=1e-3, rtol=1e-3), (out2, ref2)

    # Odd batch (padded to 8 sublanes) + prime T > max_chunk exercises the
    # padded / masked time-chunk path that replaces the old chunk=1 perf cliff.
    tokens3 = jax.random.randint(t3key, (3, 37), 0, vocab, dtype=jnp.int32)
    params3 = init_params(p3key, vocab, E, H, O, num_layers=2)
    out3 = jax.block_until_ready(lstm_classifier_forward(tokens3, params3))
    ref3 = reference_forward(tokens3, params3)
    assert out3.shape == (3, O), out3.shape
    assert jnp.allclose(out3, ref3, atol=1e-3, rtol=1e-3), (out3, ref3)

    print("KERNEL_OK")
</pallas_src>

<mosaic_0001>
module attributes {stable_mosaic.version = 11 : i64} {
  func.func @kernel(%arg0: i32, %arg1: i32, %arg2: memref<8x8x32xbf16, #tpu.memory_space<vmem>>, %arg3: memref<32x128xbf16, #tpu.memory_space<vmem>>, %arg4: memref<1x128xf32, #tpu.memory_space<vmem>>, %arg5: memref<32x128xbf16, #tpu.memory_space<vmem>>, %arg6: memref<32x4xf32, #tpu.memory_space<vmem>>, %arg7: memref<1x4xf32, #tpu.memory_space<vmem>>, %arg8: memref<8x4xf32, #tpu.memory_space<vmem>>, %arg9: memref<64x128xf32, #tpu.memory_space<vmem>>, %arg10: memref<8x32xf32, #tpu.memory_space<vmem>>, %arg11: memref<8x32xf32, #tpu.memory_space<vmem>>) attributes {dimension_semantics = [#tpu.dimension_semantics<parallel>, #tpu.dimension_semantics<arbitrary>], iteration_bounds = array<i64: 1, 1>, scalar_prefetch = 0 : i64, scratch_operands = 3 : i64, tpu.core_type = #tpu.core_type<tc>, window_params = [{transform_indices = @transform_0, window_bounds = array<i64: 8, 8, 32>}, {pipeline_mode = #tpu.pipeline_mode<synchronous>, transform_indices = @transform_1, window_bounds = array<i64: 32, 128>}, {pipeline_mode = #tpu.pipeline_mode<synchronous>, transform_indices = @transform_2, window_bounds = array<i64: 1, 128>}, {pipeline_mode = #tpu.pipeline_mode<synchronous>, transform_indices = @transform_3, window_bounds = array<i64: 32, 128>}, {pipeline_mode = #tpu.pipeline_mode<synchronous>, transform_indices = @transform_4, window_bounds = array<i64: 32, 4>}, {pipeline_mode = #tpu.pipeline_mode<synchronous>, transform_indices = @transform_5, window_bounds = array<i64: 1, 4>}, {transform_indices = @transform_6, window_bounds = array<i64: 8, 4>}]} {
    %c0_i32 = arith.constant 0 : i32
    %0 = arith.cmpi eq, %arg1, %c0_i32 : i32
    %1 = arith.extui %0 : i1 to i32
    %c0_i32_0 = arith.constant 0 : i32
    %2 = arith.cmpi ne, %1, %c0_i32_0 : i32
    scf.if %2 {
      %cst_68 = arith.constant 0.000000e+00 : f32
      %202 = vector.broadcast %cst_68 : f32 to vector<8x32xf32>
      %c0_69 = arith.constant 0 : index
      %c0_70 = arith.constant 0 : index
      %203 = vector.load %arg10[%c0_69, %c0_70] : memref<8x32xf32, #tpu.memory_space<vmem>>, vector<8x32xf32>
      tpu.vector_store %arg10[%c0_69, %c0_70], %202 {strides = array<i32>} : memref<8x32xf32, #tpu.memory_space<vmem>>, vector<8x32xf32>,
      %cst_71 = arith.constant 0.000000e+00 : f32
      %204 = vector.broadcast %cst_71 : f32 to vector<8x32xf32>
      %c0_72 = arith.constant 0 : index
      %c0_73 = arith.constant 0 : index
      %205 = vector.load %arg11[%c0_72, %c0_73] : memref<8x32xf32, #tpu.memory_space<vmem>>, vector<8x32xf32>
      tpu.vector_store %arg11[%c0_72, %c0_73], %204 {strides = array<i32>} : memref<8x32xf32, #tpu.memory_space<vmem>>, vector<8x32xf32>,
    } else {
    }
    %c0 = arith.constant 0 : index
    %c0_1 = arith.constant 0 : index
    %c0_2 = arith.constant 0 : index
    %3 = vector.load %arg2[%c0, %c0_1, %c0_2] : memref<8x8x32xbf16, #tpu.memory_space<vmem>>, vector<8x8x32xbf16>
    %4 = vector.shape_cast %3 : vector<8x8x32xbf16> to vector<64x32xbf16>
    %c0_3 = arith.constant 0 : index
    %c0_4 = arith.constant 0 : index
    %5 = vector.load %arg3[%c0_3, %c0_4] : memref<32x128xbf16, #tpu.memory_space<vmem>>, vector<32x128xbf16>
    %cst = arith.constant dense<0.000000e+00> : vector<64x128xf32>
    %6 = tpu.matmul %4, %5, %cst {dimension_numbers = #tpu.dot_dimension_numbers<[1], [0], [0], [1], [0, 0, 1, 1], [], []>} : vector<64x32xbf16>, vector<32x128xbf16>, vector<64x128xf32> -> vector<64x128xf32>
    %c0_5 = arith.constant 0 : index
    %c0_6 = arith.constant 0 : index
    %7 = vector.load %arg4[%c0_5, %c0_6] : memref<1x128xf32, #tpu.memory_space<vmem>>, vector<1x128xf32>
    %8 = vector.broadcast %7 : vector<1x128xf32> to vector<64x128xf32>
    %9 = arith.addf %6, %8 : vector<64x128xf32>
    %c0_7 = arith.constant 0 : index
    %c0_8 = arith.constant 0 : index
    %10 = vector.load %arg9[%c0_7, %c0_8] : memref<64x128xf32, #tpu.memory_space<vmem>>, vector<64x128xf32>
    tpu.vector_store %arg9[%c0_7, %c0_8], %9 {strides = array<i32>} : memref<64x128xf32, #tpu.memory_space<vmem>>, vector<64x128xf32>,
    %c0_9 = arith.constant 0 : index
    %c0_10 = arith.constant 0 : index
    %11 = vector.load %arg10[%c0_9, %c0_10] : memref<8x32xf32, #tpu.memory_space<vmem>>, vector<8x32xf32>
    %c0_11 = arith.constant 0 : index
    %c0_12 = arith.constant 0 : index
    %12 = vector.load %arg11[%c0_11, %c0_12] : memref<8x32xf32, #tpu.memory_space<vmem>>, vector<8x32xf32>
    %c0_i32_13 = arith.constant 0 : i32
    %c8_i32 = arith.constant 8 : i32
    %13 = arith.muli %c0_i32_13, %c8_i32 : i32
    %14 = tpu.assume_multiple %13, 8 : i32
    %15 = arith.index_cast %14 : i32 to index
    %c0_14 = arith.constant 0 : index
    %16 = vector.load %arg9[%15, %c0_14] : memref<64x128xf32, #tpu.memory_space<vmem>>, vector<8x128xf32>
    %17 = arith.truncf %11 : vector<8x32xf32> to vector<8x32xbf16>
    %c0_15 = arith.constant 0 : index
    %c0_16 = arith.constant 0 : index
    %18 = vector.load %arg5[%c0_15, %c0_16] : memref<32x128xbf16, #tpu.memory_space<vmem>>, vector<32x128xbf16>
    %cst_17 = arith.constant dense<0.000000e+00> : vector<8x128xf32>
    %19 = tpu.matmul %17, %18, %cst_17 {dimension_numbers = #tpu.dot_dimension_numbers<[1], [0], [0], [1], [0, 0, 1, 1], [], []>} : vector<8x32xbf16>, vector<32x128xbf16>, vector<8x128xf32> -> vector<8x128xf32>
    %20 = arith.addf %16, %19 : vector<8x128xf32>
    %21 = arith.negf %20 : vector<8x128xf32>
    %22 = math.exp %21 : vector<8x128xf32>
    %cst_18 = arith.constant 1.000000e+00 : f32
    %23 = vector.broadcast %cst_18 : f32 to vector<8x128xf32>
    %24 = arith.addf %23, %22 : vector<8x128xf32>
    %25 = arith.divf %23, %24 : vector<8x128xf32>
    %26 = math.tanh %20 : vector<8x128xf32>
    %27 = vector.extract_strided_slice %25 {offsets = [0, 0], sizes = [8, 32], strides = [1, 1]} : vector<8x128xf32> to vector<8x32xf32>
    %28 = vector.extract_strided_slice %25 {offsets = [0, 32], sizes = [8, 32], strides = [1, 1]} : vector<8x128xf32> to vector<8x32xf32>
    %29 = vector.extract_strided_slice %26 {offsets = [0, 64], sizes = [8, 32], strides = [1, 1]} : vector<8x128xf32> to vector<8x32xf32>
    %30 = vector.extract_strided_slice %25 {offsets = [0, 96], sizes = [8, 32], strides = [1, 1]} : vector<8x128xf32> to vector<8x32xf32>
    %31 = arith.mulf %28, %12 : vector<8x32xf32>
    %32 = arith.mulf %27, %29 : vector<8x32xf32>
    %33 = arith.addf %31, %32 : vector<8x32xf32>
    %34 = math.tanh %33 : vector<8x32xf32>
    %35 = arith.mulf %30, %34 : vector<8x32xf32>
    %c1_i32 = arith.constant 1 : i32
    %c8_i32_19 = arith.constant 8 : i32
    %36 = arith.muli %c1_i32, %c8_i32_19 : i32
    %37 = tpu.assume_multiple %36, 8 : i32
    %38 = arith.index_cast %37 : i32 to index
    %c0_20 = arith.constant 0 : index
    %39 = vector.load %arg9[%38, %c0_20] : memref<64x128xf32, #tpu.memory_space<vmem>>, vector<8x128xf32>
    %40 = arith.truncf %35 : vector<8x32xf32> to vector<8x32xbf16>
    %c0_21 = arith.constant 0 : index
    %c0_22 = arith.constant 0 : index
    %41 = vector.load %arg5[%c0_21, %c0_22] : memref<32x128xbf16, #tpu.memory_space<vmem>>, vector<32x128xbf16>
    %cst_23 = arith.constant dense<0.000000e+00> : vector<8x128xf32>
    %42 = tpu.matmul %40, %41, %cst_23 {dimension_numbers = #tpu.dot_dimension_numbers<[1], [0], [0], [1], [0, 0, 1, 1], [], []>} : vector<8x32xbf16>, vector<32x128xbf16>, vector<8x128xf32> -> vector<8x128xf32>
    %43 = arith.addf %39, %42 : vector<8x128xf32>
    %44 = arith.negf %43 : vector<8x128xf32>
    %45 = math.exp %44 : vector<8x128xf32>
    %cst_24 = arith.constant 1.000000e+00 : f32
    %46 = vector.broadcast %cst_24 : f32 to vector<8x128xf32>
    %47 = arith.addf %46, %45 : vector<8x128xf32>
    %48 = arith.divf %46, %47 : vector<8x128xf32>
    %49 = math.tanh %43 : vector<8x128xf32>
    %50 = vector.extract_strided_slice %48 {offsets = [0, 0], sizes = [8, 32], strides = [1, 1]} : vector<8x128xf32> to vector<8x32xf32>
    %51 = vector.extract_strided_slice %48 {offsets = [0, 32], sizes = [8, 32], strides = [1, 1]} : vector<8x128xf32> to vector<8x32xf32>
    %52 = vector.extract_strided_slice %49 {offsets = [0, 64], sizes = [8, 32], strides = [1, 1]} : vector<8x128xf32> to vector<8x32xf32>
    %53 = vector.extract_strided_slice %48 {offsets = [0, 96], sizes = [8, 32], strides = [1, 1]} : vector<8x128xf32> to vector<8x32xf32>
    %54 = arith.mulf %51, %33 : vector<8x32xf32>
    %55 = arith.mulf %50, %52 : vector<8x32xf32>
    %56 = arith.addf %54, %55 : vector<8x32xf32>
    %57 = math.tanh %56 : vector<8x32xf32>
    %58 = arith.mulf %53, %57 : vector<8x32xf32>
    %c2_i32 = arith.constant 2 : i32
    %c8_i32_25 = arith.constant 8 : i32
    %59 = arith.muli %c2_i32, %c8_i32_25 : i32
    %60 = tpu.assume_multiple %59, 8 : i32
    %61 = arith.index_cast %60 : i32 to index
    %c0_26 = arith.constant 0 : index
    %62 = vector.load %arg9[%61, %c0_26] : memref<64x128xf32, #tpu.memory_space<vmem>>, vector<8x128xf32>
    %63 = arith.truncf %58 : vector<8x32xf32> to vector<8x32xbf16>
    %c0_27 = arith.constant 0 : index
    %c0_28 = arith.constant 0 : index
    %64 = vector.load %arg5[%c0_27, %c0_28] : memref<32x128xbf16, #tpu.memory_space<vmem>>, vector<32x128xbf16>
    %cst_29 = arith.constant dense<0.000000e+00> : vector<8x128xf32>
    %65 = tpu.matmul %63, %64, %cst_29 {dimension_numbers = #tpu.dot_dimension_numbers<[1], [0], [0], [1], [0, 0, 1, 1], [], []>} : vector<8x32xbf16>, vector<32x128xbf16>, vector<8x128xf32> -> vector<8x128xf32>
    %66 = arith.addf %62, %65 : vector<8x128xf32>
    %67 = arith.negf %66 : vector<8x128xf32>
    %68 = math.exp %67 : vector<8x128xf32>
    %cst_30 = arith.constant 1.000000e+00 : f32
    %69 = vector.broadcast %cst_30 : f32 to vector<8x128xf32>
    %70 = arith.addf %69, %68 : vector<8x128xf32>
    %71 = arith.divf %69, %70 : vector<8x128xf32>
    %72 = math.tanh %66 : vector<8x128xf32>
    %73 = vector.extract_strided_slice %71 {offsets = [0, 0], sizes = [8, 32], strides = [1, 1]} : vector<8x128xf32> to vector<8x32xf32>
    %74 = vector.extract_strided_slice %71 {offsets = [0, 32], sizes = [8, 32], strides = [1, 1]} : vector<8x128xf32> to vector<8x32xf32>
    %75 = vector.extract_strided_slice %72 {offsets = [0, 64], sizes = [8, 32], strides = [1, 1]} : vector<8x128xf32> to vector<8x32xf32>
    %76 = vector.extract_strided_slice %71 {offsets = [0, 96], sizes = [8, 32], strides = [1, 1]} : vector<8x128xf32> to vector<8x32xf32>
    %77 = arith.mulf %74, %56 : vector<8x32xf32>
    %78 = arith.mulf %73, %75 : vector<8x32xf32>
    %79 = arith.addf %77, %78 : vector<8x32xf32>
    %80 = math.tanh %79 : vector<8x32xf32>
    %81 = arith.mulf %76, %80 : vector<8x32xf32>
    %c3_i32 = arith.constant 3 : i32
    %c8_i32_31 = arith.constant 8 : i32
    %82 = arith.muli %c3_i32, %c8_i32_31 : i32
    %83 = tpu.assume_multiple %82, 8 : i32
    %84 = arith.index_cast %83 : i32 to index
    %c0_32 = arith.constant 0 : index
    %85 = vector.load %arg9[%84, %c0_32] : memref<64x128xf32, #tpu.memory_space<vmem>>, vector<8x128xf32>
    %86 = arith.truncf %81 : vector<8x32xf32> to vector<8x32xbf16>
    %c0_33 = arith.constant 0 : index
    %c0_34 = arith.constant 0 : index
    %87 = vector.load %arg5[%c0_33, %c0_34] : memref<32x128xbf16, #tpu.memory_space<vmem>>, vector<32x128xbf16>
    %cst_35 = arith.constant dense<0.000000e+00> : vector<8x128xf32>
    %88 = tpu.matmul %86, %87, %cst_35 {dimension_numbers = #tpu.dot_dimension_numbers<[1], [0], [0], [1], [0, 0, 1, 1], [], []>} : vector<8x32xbf16>, vector<32x128xbf16>, vector<8x128xf32> -> vector<8x128xf32>
    %89 = arith.addf %85, %88 : vector<8x128xf32>
    %90 = arith.negf %89 : vector<8x128xf32>
    %91 = math.exp %90 : vector<8x128xf32>
    %cst_36 = arith.constant 1.000000e+00 : f32
    %92 = vector.broadcast %cst_36 : f32 to vector<8x128xf32>
    %93 = arith.addf %92, %91 : vector<8x128xf32>
    %94 = arith.divf %92, %93 : vector<8x128xf32>
    %95 = math.tanh %89 : vector<8x128xf32>
    %96 = vector.extract_strided_slice %94 {offsets = [0, 0], sizes = [8, 32], strides = [1, 1]} : vector<8x128xf32> to vector<8x32xf32>
    %97 = vector.extract_strided_slice %94 {offsets = [0, 32], sizes = [8, 32], strides = [1, 1]} : vector<8x128xf32> to vector<8x32xf32>
    %98 = vector.extract_strided_slice %95 {offsets = [0, 64], sizes = [8, 32], strides = [1, 1]} : vector<8x128xf32> to vector<8x32xf32>
    %99 = vector.extract_strided_slice %94 {offsets = [0, 96], sizes = [8, 32], strides = [1, 1]} : vector<8x128xf32> to vector<8x32xf32>
    %100 = arith.mulf %97, %79 : vector<8x32xf32>
    %101 = arith.mulf %96, %98 : vector<8x32xf32>
    %102 = arith.addf %100, %101 : vector<8x32xf32>
    %103 = math.tanh %102 : vector<8x32xf32>
    %104 = arith.mulf %99, %103 : vector<8x32xf32>
    %c4_i32 = arith.constant 4 : i32
    %c8_i32_37 = arith.constant 8 : i32
    %105 = arith.muli %c4_i32, %c8_i32_37 : i32
    %106 = tpu.assume_multiple %105, 8 : i32
    %107 = arith.index_cast %106 : i32 to index
    %c0_38 = arith.constant 0 : index
    %108 = vector.load %arg9[%107, %c0_38] : memref<64x128xf32, #tpu.memory_space<vmem>>, vector<8x128xf32>
    %109 = arith.truncf %104 : vector<8x32xf32> to vector<8x32xbf16>
    %c0_39 = arith.constant 0 : index
    %c0_40 = arith.constant 0 : index
    %110 = vector.load %arg5[%c0_39, %c0_40] : memref<32x128xbf16, #tpu.memory_space<vmem>>, vector<32x128xbf16>
    %cst_41 = arith.constant dense<0.000000e+00> : vector<8x128xf32>
    %111 = tpu.matmul %109, %110, %cst_41 {dimension_numbers = #tpu.dot_dimension_numbers<[1], [0], [0], [1], [0, 0, 1, 1], [], []>} : vector<8x32xbf16>, vector<32x128xbf16>, vector<8x128xf32> -> vector<8x128xf32>
    %112 = arith.addf %108, %111 : vector<8x128xf32>
    %113 = arith.negf %112 : vector<8x128xf32>
    %114 = math.exp %113 : vector<8x128xf32>
    %cst_42 = arith.constant 1.000000e+00 : f32
    %115 = vector.broadcast %cst_42 : f32 to vector<8x128xf32>
    %116 = arith.addf %115, %114 : vector<8x128xf32>
    %117 = arith.divf %115, %116 : vector<8x128xf32>
    %118 = math.tanh %112 : vector<8x128xf32>
    %119 = vector.extract_strided_slice %117 {offsets = [0, 0], sizes = [8, 32], strides = [1, 1]} : vector<8x128xf32> to vector<8x32xf32>
    %120 = vector.extract_strided_slice %117 {offsets = [0, 32], sizes = [8, 32], strides = [1, 1]} : vector<8x128xf32> to vector<8x32xf32>
    %121 = vector.extract_strided_slice %118 {offsets = [0, 64], sizes = [8, 32], strides = [1, 1]} : vector<8x128xf32> to vector<8x32xf32>
    %122 = vector.extract_strided_slice %117 {offsets = [0, 96], sizes = [8, 32], strides = [1, 1]} : vector<8x128xf32> to vector<8x32xf32>
    %123 = arith.mulf %120, %102 : vector<8x32xf32>
    %124 = arith.mulf %119, %121 : vector<8x32xf32>
    %125 = arith.addf %123, %124 : vector<8x32xf32>
    %126 = math.tanh %125 : vector<8x32xf32>
    %127 = arith.mulf %122, %126 : vector<8x32xf32>
    %c5_i32 = arith.constant 5 : i32
    %c8_i32_43 = arith.constant 8 : i32
    %128 = arith.muli %c5_i32, %c8_i32_43 : i32
    %129 = tpu.assume_multiple %128, 8 : i32
    %130 = arith.index_cast %129 : i32 to index
    %c0_44 = arith.constant 0 : index
    %131 = vector.load %arg9[%130, %c0_44] : memref<64x128xf32, #tpu.memory_space<vmem>>, vector<8x128xf32>
    %132 = arith.truncf %127 : vector<8x32xf32> to vector<8x32xbf16>
    %c0_45 = arith.constant 0 : index
    %c0_46 = arith.constant 0 : index
    %133 = vector.load %arg5[%c0_45, %c0_46] : memref<32x128xbf16, #tpu.memory_space<vmem>>, vector<32x128xbf16>
    %cst_47 = arith.constant dense<0.000000e+00> : vector<8x128xf32>
    %134 = tpu.matmul %132, %133, %cst_47 {dimension_numbers = #tpu.dot_dimension_numbers<[1], [0], [0], [1], [0, 0, 1, 1], [], []>} : vector<8x32xbf16>, vector<32x128xbf16>, vector<8x128xf32> -> vector<8x128xf32>
    %135 = arith.addf %131, %134 : vector<8x128xf32>
    %136 = arith.negf %135 : vector<8x128xf32>
    %137 = math.exp %136 : vector<8x128xf32>
    %cst_48 = arith.constant 1.000000e+00 : f32
    %138 = vector.broadcast %cst_48 : f32 to vector<8x128xf32>
    %139 = arith.addf %138, %137 : vector<8x128xf32>
    %140 = arith.divf %138, %139 : vector<8x128xf32>
    %141 = math.tanh %135 : vector<8x128xf32>
    %142 = vector.extract_strided_slice %140 {offsets = [0, 0], sizes = [8, 32], strides = [1, 1]} : vector<8x128xf32> to vector<8x32xf32>
    %143 = vector.extract_strided_slice %140 {offsets = [0, 32], sizes = [8, 32], strides = [1, 1]} : vector<8x128xf32> to vector<8x32xf32>
    %144 = vector.extract_strided_slice %141 {offsets = [0, 64], sizes = [8, 32], strides = [1, 1]} : vector<8x128xf32> to vector<8x32xf32>
    %145 = vector.extract_strided_slice %140 {offsets = [0, 96], sizes = [8, 32], strides = [1, 1]} : vector<8x128xf32> to vector<8x32xf32>
    %146 = arith.mulf %143, %125 : vector<8x32xf32>
    %147 = arith.mulf %142, %144 : vector<8x32xf32>
    %148 = arith.addf %146, %147 : vector<8x32xf32>
    %149 = math.tanh %148 : vector<8x32xf32>
    %150 = arith.mulf %145, %149 : vector<8x32xf32>
    %c6_i32 = arith.constant 6 : i32
    %c8_i32_49 = arith.constant 8 : i32
    %151 = arith.muli %c6_i32, %c8_i32_49 : i32
    %152 = tpu.assume_multiple %151, 8 : i32
    %153 = arith.index_cast %152 : i32 to index
    %c0_50 = arith.constant 0 : index
    %154 = vector.load %arg9[%153, %c0_50] : memref<64x128xf32, #tpu.memory_space<vmem>>, vector<8x128xf32>
    %155 = arith.truncf %150 : vector<8x32xf32> to vector<8x32xbf16>
    %c0_51 = arith.constant 0 : index
    %c0_52 = arith.constant 0 : index
    %156 = vector.load %arg5[%c0_51, %c0_52] : memref<32x128xbf16, #tpu.memory_space<vmem>>, vector<32x128xbf16>
    %cst_53 = arith.constant dense<0.000000e+00> : vector<8x128xf32>
    %157 = tpu.matmul %155, %156, %cst_53 {dimension_numbers = #tpu.dot_dimension_numbers<[1], [0], [0], [1], [0, 0, 1, 1], [], []>} : vector<8x32xbf16>, vector<32x128xbf16>, vector<8x128xf32> -> vector<8x128xf32>
    %158 = arith.addf %154, %157 : vector<8x128xf32>
    %159 = arith.negf %158 : vector<8x128xf32>
    %160 = math.exp %159 : vector<8x128xf32>
    %cst_54 = arith.constant 1.000000e+00 : f32
    %161 = vector.broadcast %cst_54 : f32 to vector<8x128xf32>
    %162 = arith.addf %161, %160 : vector<8x128xf32>
    %163 = arith.divf %161, %162 : vector<8x128xf32>
    %164 = math.tanh %158 : vector<8x128xf32>
    %165 = vector.extract_strided_slice %163 {offsets = [0, 0], sizes = [8, 32], strides = [1, 1]} : vector<8x128xf32> to vector<8x32xf32>
    %166 = vector.extract_strided_slice %163 {offsets = [0, 32], sizes = [8, 32], strides = [1, 1]} : vector<8x128xf32> to vector<8x32xf32>
    %167 = vector.extract_strided_slice %164 {offsets = [0, 64], sizes = [8, 32], strides = [1, 1]} : vector<8x128xf32> to vector<8x32xf32>
    %168 = vector.extract_strided_slice %163 {offsets = [0, 96], sizes = [8, 32], strides = [1, 1]} : vector<8x128xf32> to vector<8x32xf32>
    %169 = arith.mulf %166, %148 : vector<8x32xf32>
    %170 = arith.mulf %165, %167 : vector<8x32xf32>
    %171 = arith.addf %169, %170 : vector<8x32xf32>
    %172 = math.tanh %171 : vector<8x32xf32>
    %173 = arith.mulf %168, %172 : vector<8x32xf32>
    %c7_i32 = arith.constant 7 : i32
    %c8_i32_55 = arith.constant 8 : i32
    %174 = arith.muli %c7_i32, %c8_i32_55 : i32
    %175 = tpu.assume_multiple %174, 8 : i32
    %176 = arith.index_cast %175 : i32 to index
    %c0_56 = arith.constant 0 : index
    %177 = vector.load %arg9[%176, %c0_56] : memref<64x128xf32, #tpu.memory_space<vmem>>, vector<8x128xf32>
    %178 = arith.truncf %173 : vector<8x32xf32> to vector<8x32xbf16>
    %c0_57 = arith.constant 0 : index
    %c0_58 = arith.constant 0 : index
    %179 = vector.load %arg5[%c0_57, %c0_58] : memref<32x128xbf16, #tpu.memory_space<vmem>>, vector<32x128xbf16>
    %cst_59 = arith.constant dense<0.000000e+00> : vector<8x128xf32>
    %180 = tpu.matmul %178, %179, %cst_59 {dimension_numbers = #tpu.dot_dimension_numbers<[1], [0], [0], [1], [0, 0, 1, 1], [], []>} : vector<8x32xbf16>, vector<32x128xbf16>, vector<8x128xf32> -> vector<8x128xf32>
    %181 = arith.addf %177, %180 : vector<8x128xf32>
    %182 = arith.negf %181 : vector<8x128xf32>
    %183 = math.exp %182 : vector<8x128xf32>
    %cst_60 = arith.constant 1.000000e+00 : f32
    %184 = vector.broadcast %cst_60 : f32 to vector<8x128xf32>
    %185 = arith.addf %184, %183 : vector<8x128xf32>
    %186 = arith.divf %184, %185 : vector<8x128xf32>
    %187 = math.tanh %181 : vector<8x128xf32>
    %188 = vector.extract_strided_slice %186 {offsets = [0, 0], sizes = [8, 32], strides = [1, 1]} : vector<8x128xf32> to vector<8x32xf32>
    %189 = vector.extract_strided_slice %186 {offsets = [0, 32], sizes = [8, 32], strides = [1, 1]} : vector<8x128xf32> to vector<8x32xf32>
    %190 = vector.extract_strided_slice %187 {offsets = [0, 64], sizes = [8, 32], strides = [1, 1]} : vector<8x128xf32> to vector<8x32xf32>
    %191 = vector.extract_strided_slice %186 {offsets = [0, 96], sizes = [8, 32], strides = [1, 1]} : vector<8x128xf32> to vector<8x32xf32>
    %192 = arith.mulf %189, %171 : vector<8x32xf32>
    %193 = arith.mulf %188, %190 : vector<8x32xf32>
    %194 = arith.addf %192, %193 : vector<8x32xf32>
    %195 = math.tanh %194 : vector<8x32xf32>
    %196 = arith.mulf %191, %195 : vector<8x32xf32>
    %c8_i32_61 = arith.constant 8 : i32
    %c0_62 = arith.constant 0 : index
    %c0_63 = arith.constant 0 : index
    %197 = vector.load %arg10[%c0_62, %c0_63] : memref<8x32xf32, #tpu.memory_space<vmem>>, vector<8x32xf32>
    tpu.vector_store %arg10[%c0_62, %c0_63], %196 {strides = array<i32>} : memref<8x32xf32, #tpu.memory_space<vmem>>, vector<8x32xf32>,
    %c0_64 = arith.constant 0 : index
    %c0_65 = arith.constant 0 : index
    %198 = vector.load %arg11[%c0_64, %c0_65] : memref<8x32xf32, #tpu.memory_space<vmem>>, vector<8x32xf32>
    tpu.vector_store %arg11[%c0_64, %c0_65], %194 {strides = array<i32>} : memref<8x32xf32, #tpu.memory_space<vmem>>, vector<8x32xf32>,
    %c0_i32_66 = arith.constant 0 : i32
    %199 = arith.cmpi eq, %arg1, %c0_i32_66 : i32
    %200 = arith.extui %199 : i1 to i32
    %c0_i32_67 = arith.constant 0 : i32
    %201 = arith.cmpi ne, %200, %c0_i32_67 : i32
    scf.if %201 {
      %c0_68 = arith.constant 0 : index
      %c0_69 = arith.constant 0 : index
      %202 = vector.load %arg6[%c0_68, %c0_69] : memref<32x4xf32, #tpu.memory_space<vmem>>, vector<32x4xf32>
      %cst_70 = arith.constant dense<0.000000e+00> : vector<8x4xf32>
      %203 = tpu.matmul %196, %202, %cst_70 {dimension_numbers = #tpu.dot_dimension_numbers<[1], [0], [0], [1], [0, 0, 1, 1], [], []>} : vector<8x32xf32>, vector<32x4xf32>, vector<8x4xf32> -> vector<8x4xf32>
      %c0_71 = arith.constant 0 : index
      %c0_72 = arith.constant 0 : index
      %204 = vector.load %arg7[%c0_71, %c0_72] : memref<1x4xf32, #tpu.memory_space<vmem>>, vector<1x4xf32>
      %205 = vector.broadcast %204 : vector<1x4xf32> to vector<8x4xf32>
      %206 = arith.addf %203, %205 : vector<8x4xf32>
      %cst_73 = arith.constant dense<0xFF800000> : vector<8xf32>
      %207 = vector.multi_reduction <maximumf>, %206, %cst_73 [1] : vector<8x4xf32> to vector<8xf32>
      %208 = vector.shape_cast %207 : vector<8xf32> to vector<8x1xf32>
      %209 = vector.broadcast %208 : vector<8x1xf32> to vector<8x4xf32>
      %210 = arith.subf %206, %209 : vector<8x4xf32>
      %211 = math.exp %210 : vector<8x4xf32>
      %cst_74 = arith.constant dense<0.000000e+00> : vector<8xf32>
      %212 = vector.multi_reduction <add>, %211, %cst_74 [1] : vector<8x4xf32> to vector<8xf32>
      %213 = vector.shape_cast %212 : vector<8xf32> to vector<8x1xf32>
      %214 = vector.broadcast %213 : vector<8x1xf32> to vector<8x4xf32>
      %215 = arith.divf %211, %214 : vector<8x4xf32>
      %c0_75 = arith.constant 0 : index
      %c0_76 = arith.constant 0 : index
      %216 = vector.load %arg8[%c0_75, %c0_76] : memref<8x4xf32, #tpu.memory_space<vmem>>, vector<8x4xf32>
      tpu.vector_store %arg8[%c0_75, %c0_76], %215 {strides = array<i32>} : memref<8x4xf32, #tpu.memory_space<vmem>>, vector<8x4xf32>,
    } else {
    }
    return
  }
  func.func @transform_0(%arg0: i32, %arg1: i32) -> (i32, i32, i32) {
    %c0_i32 = arith.constant 0 : i32
    %c0_i32_0 = arith.constant 0 : i32
    return %arg1, %arg0, %c0_i32 : i32, i32, i32
  }
  func.func @transform_1(%arg0: i32, %arg1: i32) -> (i32, i32) {
    %c0_i32 = arith.constant 0 : i32
    %c0_i32_0 = arith.constant 0 : i32
    %c0_i32_1 = arith.constant 0 : i32
    return %c0_i32, %c0_i32_0 : i32, i32
  }
  func.func @transform_2(%arg0: i32, %arg1: i32) -> (i32, i32) {
    %c0_i32 = arith.constant 0 : i32
    %c0_i32_0 = arith.constant 0 : i32
    %c0_i32_1 = arith.constant 0 : i32
    return %c0_i32, %c0_i32_0 : i32, i32
  }
  func.func @transform_3(%arg0: i32, %arg1: i32) -> (i32, i32) {
    %c0_i32 = arith.constant 0 : i32
    %c0_i32_0 = arith.constant 0 : i32
    %c0_i32_1 = arith.constant 0 : i32
    return %c0_i32, %c0_i32_0 : i32, i32
  }
  func.func @transform_4(%arg0: i32, %arg1: i32) -> (i32, i32) {
    %c0_i32 = arith.constant 0 : i32
    %c0_i32_0 = arith.constant 0 : i32
    %c0_i32_1 = arith.constant 0 : i32
    return %c0_i32, %c0_i32_0 : i32, i32
  }
  func.func @transform_5(%arg0: i32, %arg1: i32) -> (i32, i32) {
    %c0_i32 = arith.constant 0 : i32
    %c0_i32_0 = arith.constant 0 : i32
    %c0_i32_1 = arith.constant 0 : i32
    return %c0_i32, %c0_i32_0 : i32, i32
  }
  func.func @transform_6(%arg0: i32, %arg1: i32) -> (i32, i32) {
    %c0_i32 = arith.constant 0 : i32
    %c0_i32_0 = arith.constant 0 : i32
    return %arg0, %c0_i32 : i32, i32
  }
}

</mosaic_0001>

<bundles_post_ra>
// kernel: tpu_custom_call.1
= control target key start
LH: loop header
LB: loop body
LE: loop exit
PB: predicated region body
PF: predicated region fallthrough
CT: control target
= control target key end

     0   :  { %11 = vsyncpa [#allocation6], 0  ;;  %s1092_s0 = inlined_call_operand.vmem [shape: bf16[8,8,32], index: 0, kind: input, shape index: {}]   ;;  %s1093_s1 = inlined_call_operand.hbm [shape: bf16[32,128], index: 1, kind: input, shape index: {}]   ;;  %s1094_s2 = inlined_call_operand.vmem [shape: f32[1,128], index: 2, kind: input, shape index: {}]   ;;  %s1095_s3 = inlined_call_operand.hbm [shape: bf16[32,128], index: 3, kind: input, shape index: {}]   ;;  %s1096_s4 = inlined_call_operand.vmem [shape: f32[32,4], index: 4, kind: input, shape index: {}]   ;;  %s1097_s5 = inlined_call_operand.vmem [shape: f32[1,4], index: 5, kind: input, shape index: {}]   ;;  %s1098_s6 = inlined_call_operand.vmem [shape: f32[8,4], index: 6, kind: output, shape index: {}]  }
   0x1   :  { %s19_s23 = sshll.u32 %s1093_s1, 4  ;;  %s20_s23 = int_to_ptr.hbm [resolvable:$true] %s19_s23 }
   0x2   :  { %12 = vsyncpa [#allocation8], 0  ;;  %s924_s24 = smov [#allocation5]   ;;  %s34_s28 = sshll.u32 %s1095_s3, 4  ;;  %s35_s28 = int_to_ptr.hbm [resolvable:$true] %s34_s28 }
   0x3   :  { %s21_s25 = sshll.u32 %s924_s24, 4  ;;  %s925_s29 = smov 64   ;;  %s22_s25 = int_to_ptr.vmem [resolvable:$true] %s21_s25 }
   0x4   :  { %s926_s30 = smov 4   ;;  %s927_s7 = smov [#allocation7]  }
   0x5   :  { %27 = dma.hbm_to_vmem [thread:$0]  %s20_s23, 256, %s22_s25, [#allocation6], %s925_s29, %s925_s29, %s926_s30  }
   0x6   :  { %s36_s8 = sshll.u32 %s927_s7, 4  ;;  %s37_s8 = int_to_ptr.vmem [resolvable:$true] %s36_s8 }
   0x7   :  { %42 = dma.hbm_to_vmem [thread:$0]  %s35_s28, 256, %s37_s8, [#allocation8], %s925_s29, %s925_s29, %s926_s30  }
   0x8   :  { %920 = dma.done.wait [#allocation6], 256  }
   0x9   :  { %921 = vsyncadd [#allocation6], 4294967040 }
   0xa   :  { %922 = dma.done.wait [#allocation8], 256  }
   0xb   :  { %923 = vsyncadd [#allocation8], 4294967040  ;;  %vm60_vm0 = vcmask 261120   ;;  %v928_v0 = vmov 0.0   ;;  %v792_v1 = vld [vmem:[#allocation5 + $0x8] sm:$0xff]  ;;  %v978_v2 = vld [vmem:[#allocation7 + $0x8] sm:$0xff] }
   0xc   :  { %61 = vst.msk [vmem:[#allocation3] sm:$0xff] %vm60_vm0, %v928_v0  ;;  %v791_v3 = vld [vmem:[#allocation5] sm:$0xff]  ;;  %v980_v4 = vld [vmem:[#allocation7] sm:$0xff]  ;;  %130 = vmatpush.bf16.msra.mxu0 %v792_v1  ;;  %190 = vmatpush.bf16.msra.mxu1 %v978_v2  ;;  %s929_s11 = smov 32   ;;  %v788_v1 = vld [vmem:[%s1092_s0 + $0x8] sm:$0xff]  ;;  %s930_s24 = smov 96  }
   0xd   :  { %62 = vst.msk [vmem:[#allocation4] sm:$0xff] %vm60_vm0, %v928_v0  ;;  %254 = vmatpush.bf16.msra.mxu2 %v978_v2  ;;  %314 = vmatpush.bf16.msra.mxu3 %v978_v2  ;;  %v787_v6 = vld [vmem:[%s1092_s0] sm:$0xff] }
   0xe   :  { %v1004_v8 = vld [vmem:[%s1094_s2] ss:$0 sm:$0xff] }
  0x10   :  { %131 = vmatpush.bf16.msra.mxu0 %v791_v3  ;;  %191 = vmatpush.bf16.msra.mxu1 %v980_v4 }
  0x11   :  { %255 = vmatpush.bf16.msra.mxu2 %v980_v4  ;;  %315 = vmatpush.bf16.msra.mxu3 %v980_v4 }
  0x13   :  { %v161_v5 = vld [vmem:[#allocation3] sm:$0xff]  ;;  %758 = vmatmul.msk.bf16.vlgmr.msra.gmra.mxu0 %vm60_vm0, %v787_v6 }
  0x14   :  { %v164_v7 = vpack.c.bf16 %v161_v5, %v161_v5  ;;  %374 = vmatpush.bf16.msrb.mxu1 %v978_v2  ;;  %v162_v15 = vld [vmem:[#allocation4] sm:$0xff] }
  0x15   :  { %434 = vmatpush.bf16.msrb.mxu2 %v978_v2  ;;  %494 = vmatpush.bf16.msrb.mxu3 %v978_v2 }
  0x16   :  { %770 = vmatmul.msk.bf16.vlgmr.msra.gmra.mxu1 %vm60_vm0, %v164_v7 }
  0x18   :  { %375 = vmatpush.bf16.msrb.mxu1 %v980_v4 }
  0x19   :  { %435 = vmatpush.bf16.msrb.mxu2 %v980_v4  ;;  %495 = vmatpush.bf16.msrb.mxu3 %v980_v4 }
  0x1c   :  { %554 = vmatpush.bf16.msra.mxu1 %v978_v2 }
  0x20   :  { %555 = vmatpush.bf16.msra.mxu1 %v980_v4 }
  0x23   :  { %759 = vmatmul.msk.bf16.gmra.mxu0 %vm60_vm0, %v788_v1 }
  0x90   :  { %v133_v9 = vpop.f32.mrf.mxu0 }
  0x91   :  { %v134_v11 = vadd.f32 %v1004_v8, %v133_v9 }
  0x93   :  { %v193_v10 = vpop.f32.mrf.mxu1 }
  0x94   :  { %v197_v12 = vadd.f32 %v193_v10, %v134_v11 }
  0x96   :  { %804 = vtanh.f32 %v197_v12  ;;  %v771_v16 = vmul.f32 -1.442695, %v197_v12 }
  0x98   :  { %806 = vpow2.f32 %v771_v16  ;;  %v135_v40 = vpop.f32.mrf.mxu0 }
  0x99   :  { %v136_v41 = vadd.f32 %v1004_v8, %v135_v40 }
  0x9b   :  { %v195_v13 = vpop.f32.mrf.mxu1 }
  0x9c   :  { %v805_v14 = vpop.eup %804 }
  0x9d   :  { %224 = vrot.lane.b32.xlu0 %v805_v14, %s925_s29 }
  0x9e   :  { %v807_v17 = vpop.eup %806 }
  0x9f   :  { %v201_v18 = vadd.f32 1.0, %v807_v17 }
  0xa0   :  { %v138_v6 = vpop.f32.mrf.mxu0 }
  0xa1   :  { %808 = vrcp.f32 %v201_v18  ;;  %v213_v24 = vand.u32 2147483648, %v201_v18  ;;  %vm207_vm2 = vweird.f32 %v201_v18  ;;  %v211_v25 = vand.u32 2147483647, %v201_v18 }
  0xa2   :  { %v139_v7 = vadd.f32 %v1004_v8, %v138_v6 }
  0xa3   :  { %v214_v27 = vor.u32 1.1754944e-38, %v213_v24  ;;  %vm212_vm4 = vcmp.eq.f32.partialorder %v211_v25, 8.507059e+37 }
  0xa5   :  { %219 = vrot.lane.b32.xlu0 %v162_v15, %s929_s11 }
  0xa7   :  { %v809_v19 = vpop.eup %808 }
  0xa8   :  { %v203_v20 = vmul.f32 %v809_v19, %v201_v18  ;;  %vm208_vm1 = vweird.f32 %v809_v19 }
  0xa9   :  { %vm209_vm3 = vmor %vm207_vm2, %vm208_vm1 }
  0xaa   :  { %v204_v21 = vsub.f32 1.0, %v203_v20 }
  0xac   :  { %v205_v22 = vmul.f32 %v809_v19, %v204_v21 }
  0xae   :  { %v206_v23 = vadd.f32 %v809_v19, %v205_v22 }
  0xb0   :  { %v210_v26 = vsel %vm209_vm3, %v809_v19, %v206_v23 }
  0xb1   :  { %v215_v29 = vsel %vm212_vm4, %v214_v27, %v210_v26 }
 0x10f   :  { %v225_v28 = vpop.permute.xlu0 %224 }
 0x110   :  { %v227_v30 = vmul.f32 %v225_v28, %v215_v29 }
 0x112   :  { %229 = vrot.lane.b32.xlu1 %v227_v30, %s929_s11 }
 0x117   :  { %v220_v31 = vpop.permute.xlu0 %219 }
 0x118   :  { %v222_v32 = vmul.f32 %v220_v31, %v215_v29 }
 0x184   :  { %v230_v33 = vpop.permute.xlu1 %229 }
 0x185   :  { %v232_v34 = vadd.f32 %v230_v33, %v222_v32 }
 0x187   :  { %810 = vtanh.f32 %v232_v34 }
 0x18d   :  { %v811_v35 = vpop.eup %810 }
 0x18e   :  { %235 = vrot.lane.b32.xlu1 %v811_v35, %s925_s29 }
 0x200   :  { %v236_v36 = vpop.permute.xlu1 %235 }
 0x201   :  { %v238_v37 = vmul.f32 %v236_v36, %v215_v29  ;;  %v140_v36 = vpop.f32.mrf.mxu0 }
 0x203   :  { %v241_v38 = vpack.c.bf16 %v238_v37, %v238_v37  ;;  %v141_v37 = vadd.f32 %v1004_v8, %v140_v36 }
 0x205   :  { %243 = vrot.lane.b32.xlu2 %v241_v38, %s929_s11 }
 0x25f   :  { %v244_v39 = vpop.permute.xlu2 %243 }
 0x260   :  { %772 = vmatmul.msk.bf16.vlgmr.msra.gmra.mxu2 %vm60_vm0, %v244_v39 }
 0x261   :  { %614 = vmatpush.bf16.msra.mxu2 %v978_v2 }
 0x265   :  { %615 = vmatpush.bf16.msra.mxu2 %v980_v4 }
 0x2e3   :  { %v257_v42 = vpop.f32.mrf.mxu2 }
 0x2e4   :  { %v261_v43 = vadd.f32 %v257_v42, %v136_v41 }
 0x2e6   :  { %812 = vtanh.f32 %v261_v43  ;;  %v773_v46 = vmul.f32 -1.442695, %v261_v43 }
 0x2e8   :  { %814 = vpow2.f32 %v773_v46 }
 0x2eb   :  { %v259_v44 = vpop.f32.mrf.mxu2 }
 0x2ec   :  { %v813_v45 = vpop.eup %812 }
 0x2ed   :  { %284 = vrot.lane.b32.xlu2 %v813_v45, %s925_s29 }
 0x2ee   :  { %v815_v47 = vpop.eup %814 }
 0x2ef   :  { %v265_v48 = vadd.f32 1.0, %v815_v47 }
 0x2f1   :  { %816 = vrcp.f32 %v265_v48  ;;  %v277_v54 = vand.u32 2147483648, %v265_v48  ;;  %vm271_vm6 = vweird.f32 %v265_v48  ;;  %v275_v55 = vand.u32 2147483647, %v265_v48 }
 0x2f3   :  { %v278_v57 = vor.u32 1.1754944e-38, %v277_v54  ;;  %vm276_vm8 = vcmp.eq.f32.partialorder %v275_v55, 8.507059e+37 }
 0x2f7   :  { %v817_v49 = vpop.eup %816 }
 0x2f8   :  { %v267_v50 = vmul.f32 %v817_v49, %v265_v48  ;;  %vm272_vm5 = vweird.f32 %v817_v49 }
 0x2f9   :  { %vm273_vm7 = vmor %vm271_vm6, %vm272_vm5 }
 0x2fa   :  { %v268_v51 = vsub.f32 1.0, %v267_v50 }
 0x2fc   :  { %v269_v52 = vmul.f32 %v817_v49, %v268_v51 }
 0x2fe   :  { %v270_v53 = vadd.f32 %v817_v49, %v269_v52 }
 0x300   :  { %v274_v56 = vsel %vm273_vm7, %v817_v49, %v270_v53 }
 0x301   :  { %v279_v59 = vsel %vm276_vm8, %v278_v57, %v274_v56 }
 0x302   :  { %v282_v61 = vmul.f32 %v279_v59, %v232_v34 }
 0x347   :  { %v285_v58 = vpop.permute.xlu2 %284 }
 0x348   :  { %v287_v60 = vmul.f32 %v285_v58, %v279_v59 }
 0x34a   :  { %289 = vrot.lane.b32.xlu0 %v287_v60, %s929_s11 }
 0x3bc   :  { %v290_v62 = vpop.permute.xlu0 %289 }
 0x3bd   :  { %v292_v63 = vadd.f32 %v290_v62, %v282_v61  ;;  %v789_v61 = vld [vmem:[%s1092_s0 + $0x10] sm:$0xff] }
 0x3be   :  { %760 = vmatmul.msk.bf16.gmra.mxu0 %vm60_vm0, %v789_v61 }
 0x3bf   :  { %818 = vtanh.f32 %v292_v63 }
 0x3c5   :  { %v819_v0 = vpop.eup %818 }
 0x3c6   :  { %295 = vrot.lane.b32.xlu1 %v819_v0, %s925_s29 }
 0x438   :  { %v296_v2 = vpop.permute.xlu1 %295 }
 0x439   :  { %v298_v3 = vmul.f32 %v296_v2, %v279_v59 }
 0x43b   :  { %v301_v4 = vpack.c.bf16 %v298_v3, %v298_v3  ;;  %v143_v2 = vpop.f32.mrf.mxu0 }
 0x43c   :  { %v144_v3 = vadd.f32 %v1004_v8, %v143_v2 }
 0x43d   :  { %303 = vrot.lane.b32.xlu2 %v301_v4, %s929_s11 }
 0x497   :  { %v304_v5 = vpop.permute.xlu2 %303 }
 0x498   :  { %774 = vmatmul.msk.bf16.vlgmr.msra.gmra.mxu3 %vm60_vm0, %v304_v5 }
 0x51b   :  { %v317_v9 = vpop.f32.mrf.mxu3 }
 0x51c   :  { %v321_v10 = vadd.f32 %v317_v9, %v139_v7 }
 0x51e   :  { %820 = vtanh.f32 %v321_v10  ;;  %v775_v13 = vmul.f32 -1.442695, %v321_v10 }
 0x520   :  { %822 = vpow2.f32 %v775_v13 }
 0x523   :  { %v319_v11 = vpop.f32.mrf.mxu3 }
 0x524   :  { %v821_v12 = vpop.eup %820 }
 0x525   :  { %344 = vrot.lane.b32.xlu0 %v821_v12, %s925_s29 }
 0x526   :  { %v823_v14 = vpop.eup %822 }
 0x527   :  { %v325_v15 = vadd.f32 1.0, %v823_v14 }
 0x529   :  { %824 = vrcp.f32 %v325_v15  ;;  %v337_v21 = vand.u32 2147483648, %v325_v15  ;;  %vm331_vm10 = vweird.f32 %v325_v15  ;;  %v335_v22 = vand.u32 2147483647, %v325_v15 }
 0x52b   :  { %v338_v24 = vor.u32 1.1754944e-38, %v337_v21  ;;  %vm336_vm12 = vcmp.eq.f32.partialorder %v335_v22, 8.507059e+37 }
 0x52f   :  { %v825_v16 = vpop.eup %824 }
 0x530   :  { %v327_v17 = vmul.f32 %v825_v16, %v325_v15  ;;  %vm332_vm9 = vweird.f32 %v825_v16 }
 0x531   :  { %vm333_vm11 = vmor %vm331_vm10, %vm332_vm9 }
 0x532   :  { %v328_v18 = vsub.f32 1.0, %v327_v17 }
 0x534   :  { %v329_v19 = vmul.f32 %v825_v16, %v328_v18 }
 0x536   :  { %v330_v20 = vadd.f32 %v825_v16, %v329_v19 }
 0x538   :  { %v334_v23 = vsel %vm333_vm11, %v825_v16, %v330_v20 }
 0x539   :  { %v339_v26 = vsel %vm336_vm12, %v338_v24, %v334_v23 }
 0x53a   :  { %v342_v28 = vmul.f32 %v339_v26, %v292_v63 }
 0x597   :  { %v345_v25 = vpop.permute.xlu0 %344 }
 0x598   :  { %v347_v27 = vmul.f32 %v345_v25, %v339_v26 }
 0x59a   :  { %349 = vrot.lane.b32.xlu1 %v347_v27, %s929_s11 }
 0x60c   :  { %v350_v29 = vpop.permute.xlu1 %349 }
 0x60d   :  { %v352_v30 = vadd.f32 %v350_v29, %v342_v28 }
 0x60f   :  { %826 = vtanh.f32 %v352_v30 }
 0x615   :  { %v827_v31 = vpop.eup %826 }
 0x616   :  { %355 = vrot.lane.b32.xlu2 %v827_v31, %s925_s29 }
 0x670   :  { %v356_v32 = vpop.permute.xlu2 %355 }
 0x671   :  { %v358_v33 = vmul.f32 %v356_v32, %v339_v26  ;;  %v145_v32 = vpop.f32.mrf.mxu0 }
 0x673   :  { %v361_v34 = vpack.c.bf16 %v358_v33, %v358_v33  ;;  %v146_v33 = vadd.f32 %v1004_v8, %v145_v32 }
 0x675   :  { %363 = vrot.lane.b32.xlu0 %v361_v34, %s929_s11 }
 0x6e7   :  { %v364_v35 = vpop.permute.xlu0 %363 }
 0x6e8   :  { %776 = vmatmul.msk.bf16.vlgmr.msrb.gmra.mxu1 %vm60_vm0, %v364_v35 }
 0x765   :  { %v377_v38 = vpop.f32.mrf.mxu1 }
 0x766   :  { %v381_v39 = vadd.f32 %v377_v38, %v141_v37 }
 0x768   :  { %828 = vtanh.f32 %v381_v39  ;;  %v777_v42 = vmul.f32 -1.442695, %v381_v39 }
 0x76a   :  { %830 = vpow2.f32 %v777_v42 }
 0x76d   :  { %v379_v40 = vpop.f32.mrf.mxu1 }
 0x76e   :  { %v829_v41 = vpop.eup %828 }
 0x76f   :  { %404 = vrot.lane.b32.xlu1 %v829_v41, %s925_s29 }
 0x770   :  { %v831_v43 = vpop.eup %830 }
 0x771   :  { %v385_v44 = vadd.f32 1.0, %v831_v43 }
 0x773   :  { %832 = vrcp.f32 %v385_v44  ;;  %v397_v50 = vand.u32 2147483648, %v385_v44  ;;  %vm391_vm14 = vweird.f32 %v385_v44  ;;  %v395_v51 = vand.u32 2147483647, %v385_v44 }
 0x775   :  { %v398_v53 = vor.u32 1.1754944e-38, %v397_v50  ;;  %vm396_vm1 = vcmp.eq.f32.partialorder %v395_v51, 8.507059e+37 }
 0x779   :  { %v833_v45 = vpop.eup %832 }
 0x77a   :  { %v387_v46 = vmul.f32 %v833_v45, %v385_v44  ;;  %vm392_vm13 = vweird.f32 %v833_v45 }
 0x77b   :  { %vm393_vm15 = vmor %vm391_vm14, %vm392_vm13 }
 0x77c   :  { %v388_v47 = vsub.f32 1.0, %v387_v46 }
 0x77e   :  { %v389_v48 = vmul.f32 %v833_v45, %v388_v47 }
 0x780   :  { %v390_v49 = vadd.f32 %v833_v45, %v389_v48 }
 0x782   :  { %v394_v52 = vsel %vm393_vm15, %v833_v45, %v390_v49 }
 0x783   :  { %v399_v55 = vsel %vm396_vm1, %v398_v53, %v394_v52 }
 0x784   :  { %v402_v57 = vmul.f32 %v399_v55, %v352_v30 }
 0x7e1   :  { %v405_v54 = vpop.permute.xlu1 %404 }
 0x7e2   :  { %v407_v56 = vmul.f32 %v405_v54, %v399_v55 }
 0x7e4   :  { %409 = vrot.lane.b32.xlu2 %v407_v56, %s929_s11 }
 0x83e   :  { %v410_v58 = vpop.permute.xlu2 %409 }
 0x83f   :  { %v412_v59 = vadd.f32 %v410_v58, %v402_v57  ;;  %v790_v57 = vld [vmem:[%s1092_s0 + $0x18] sm:$0xff] }
 0x840   :  { %761 = vmatmul.msk.bf16.gmra.mxu0 %vm60_vm0, %v790_v57 }
 0x841   :  { %834 = vtanh.f32 %v412_v59 }
 0x847   :  { %v835_v60 = vpop.eup %834 }
 0x848   :  { %415 = vrot.lane.b32.xlu0 %v835_v60, %s925_s29 }
 0x8ba   :  { %v416_v62 = vpop.permute.xlu0 %415 }
 0x8bb   :  { %v418_v63 = vmul.f32 %v416_v62, %v399_v55 }
 0x8bd   :  { %v421_v0 = vpack.c.bf16 %v418_v63, %v418_v63  ;;  %v148_v62 = vpop.f32.mrf.mxu0 }
 0x8be   :  { %v149_v63 = vadd.f32 %v1004_v8, %v148_v62 }
 0x8bf   :  { %423 = vrot.lane.b32.xlu1 %v421_v0, %s929_s11 }
 0x931   :  { %v424_v1 = vpop.permute.xlu1 %423 }
 0x932   :  { %778 = vmatmul.msk.bf16.vlgmr.msrb.gmra.mxu2 %vm60_vm0, %v424_v1 }
 0x9b5   :  { %v437_v4 = vpop.f32.mrf.mxu2 }
 0x9b6   :  { %v441_v5 = vadd.f32 %v437_v4, %v144_v3 }
 0x9b8   :  { %836 = vtanh.f32 %v441_v5  ;;  %v779_v9 = vmul.f32 -1.442695, %v441_v5 }
 0x9ba   :  { %838 = vpow2.f32 %v779_v9 }
 0x9bd   :  { %v439_v6 = vpop.f32.mrf.mxu2 }
 0x9be   :  { %v837_v7 = vpop.eup %836 }
 0x9bf   :  { %464 = vrot.lane.b32.xlu2 %v837_v7, %s925_s29 }
 0x9c0   :  { %v839_v10 = vpop.eup %838 }
 0x9c1   :  { %v445_v11 = vadd.f32 1.0, %v839_v10 }
 0x9c3   :  { %840 = vrcp.f32 %v445_v11  ;;  %v457_v17 = vand.u32 2147483648, %v445_v11  ;;  %vm451_vm3 = vweird.f32 %v445_v11  ;;  %v455_v18 = vand.u32 2147483647, %v445_v11 }
 0x9c5   :  { %v458_v20 = vor.u32 1.1754944e-38, %v457_v17  ;;  %vm456_vm5 = vcmp.eq.f32.partialorder %v455_v18, 8.507059e+37 }
 0x9c9   :  { %v841_v12 = vpop.eup %840 }
 0x9ca   :  { %v447_v13 = vmul.f32 %v841_v12, %v445_v11  ;;  %vm452_vm2 = vweird.f32 %v841_v12 }
 0x9cb   :  { %vm453_vm4 = vmor %vm451_vm3, %vm452_vm2  ;;  %vm702_vm3 = vcmask 31744  }
 0x9cc   :  { %v448_v14 = vsub.f32 1.0, %v447_v13 }
 0x9ce   :  { %v449_v15 = vmul.f32 %v841_v12, %v448_v14 }
 0x9d0   :  { %v450_v16 = vadd.f32 %v841_v12, %v449_v15 }
 0x9d2   :  { %v454_v19 = vsel %vm453_vm4, %v841_v12, %v450_v16 }
 0x9d3   :  { %v459_v22 = vsel %vm456_vm5, %v458_v20, %v454_v19 }
 0x9d4   :  { %v462_v24 = vmul.f32 %v459_v22, %v412_v59 }
 0xa19   :  { %v465_v21 = vpop.permute.xlu2 %464 }
 0xa1a   :  { %v467_v23 = vmul.f32 %v465_v21, %v459_v22 }
 0xa1c   :  { %469 = vrot.lane.b32.xlu0 %v467_v23, %s929_s11 }
 0xa8e   :  { %v470_v25 = vpop.permute.xlu0 %469 }
 0xa8f   :  { %v472_v26 = vadd.f32 %v470_v25, %v462_v24 }
 0xa91   :  { %842 = vtanh.f32 %v472_v26 }
 0xa97   :  { %v843_v27 = vpop.eup %842 }
 0xa98   :  { %475 = vrot.lane.b32.xlu1 %v843_v27, %s925_s29 }
 0xb0a   :  { %v476_v28 = vpop.permute.xlu1 %475 }
 0xb0b   :  { %v478_v29 = vmul.f32 %v476_v28, %v459_v22  ;;  %v150_v28 = vpop.f32.mrf.mxu0 }
 0xb0d   :  { %v481_v30 = vpack.c.bf16 %v478_v29, %v478_v29  ;;  %v151_v29 = vadd.f32 %v1004_v8, %v150_v28 }
 0xb0f   :  { %483 = vrot.lane.b32.xlu2 %v481_v30, %s929_s11 }
 0xb69   :  { %v484_v31 = vpop.permute.xlu2 %483 }
 0xb6a   :  { %780 = vmatmul.msk.bf16.vlgmr.msrb.gmra.mxu3 %vm60_vm0, %v484_v31 }
 0xbed   :  { %v497_v34 = vpop.f32.mrf.mxu3 }
 0xbee   :  { %v501_v35 = vadd.f32 %v497_v34, %v146_v33 }
 0xbf0   :  { %844 = vtanh.f32 %v501_v35  ;;  %v781_v38 = vmul.f32 -1.442695, %v501_v35 }
 0xbf2   :  { %846 = vpow2.f32 %v781_v38 }
 0xbf5   :  { %v499_v36 = vpop.f32.mrf.mxu3 }
 0xbf6   :  { %v845_v37 = vpop.eup %844 }
 0xbf7   :  { %524 = vrot.lane.b32.xlu0 %v845_v37, %s925_s29 }
 0xbf8   :  { %v847_v39 = vpop.eup %846 }
 0xbf9   :  { %v505_v40 = vadd.f32 1.0, %v847_v39 }
 0xbfb   :  { %848 = vrcp.f32 %v505_v40  ;;  %v517_v46 = vand.u32 2147483648, %v505_v40  ;;  %vm511_vm7 = vweird.f32 %v505_v40  ;;  %v515_v47 = vand.u32 2147483647, %v505_v40 }
 0xbfd   :  { %v518_v49 = vor.u32 1.1754944e-38, %v517_v46  ;;  %vm516_vm9 = vcmp.eq.f32.partialorder %v515_v47, 8.507059e+37 }
 0xc01   :  { %v849_v41 = vpop.eup %848 }
 0xc02   :  { %v507_v42 = vmul.f32 %v849_v41, %v505_v40  ;;  %vm512_vm6 = vweird.f32 %v849_v41 }
 0xc03   :  { %vm513_vm8 = vmor %vm511_vm7, %vm512_vm6 }
 0xc04   :  { %v508_v43 = vsub.f32 1.0, %v507_v42 }
 0xc06   :  { %v509_v44 = vmul.f32 %v849_v41, %v508_v43 }
 0xc08   :  { %v510_v45 = vadd.f32 %v849_v41, %v509_v44 }
 0xc0a   :  { %v514_v48 = vsel %vm513_vm8, %v849_v41, %v510_v45 }
 0xc0b   :  { %v519_v51 = vsel %vm516_vm9, %v518_v49, %v514_v48 }
 0xc0c   :  { %v522_v53 = vmul.f32 %v519_v51, %v472_v26 }
 0xc69   :  { %v525_v50 = vpop.permute.xlu0 %524 }
 0xc6a   :  { %v527_v52 = vmul.f32 %v525_v50, %v519_v51 }
 0xc6c   :  { %529 = vrot.lane.b32.xlu1 %v527_v52, %s929_s11  ;;  %v675_v52 = vld [vmem:[%s1096_s4 + $0x18] sm:$0xff] }
 0xc6d   :  { %694 = vmatpush.msra.mxu3 %v675_v52 }
 0xcde   :  { %v530_v54 = vpop.permute.xlu1 %529 }
 0xcdf   :  { %v532_v55 = vadd.f32 %v530_v54, %v522_v53  ;;  %v674_v53 = vld [vmem:[%s1096_s4 + $0x10] sm:$0xff]  ;;  %v673_v54 = vld [vmem:[%s1096_s4 + $0x8] sm:$0xff] }
 0xce0   :  { %695 = vmatpush.msra.mxu3 %v674_v53 }
 0xce1   :  { %850 = vtanh.f32 %v532_v55 }
 0xce2   :  { %696 = vmatpush.msra.mxu3 %v673_v54 }
 0xce7   :  { %v851_v56 = vpop.eup %850 }
 0xce8   :  { %535 = vrot.lane.b32.xlu2 %v851_v56, %s925_s29 }
 0xd42   :  { %v536_v58 = vpop.permute.xlu2 %535 }
 0xd43   :  { %v538_v59 = vmul.f32 %v536_v58, %v519_v51 }
 0xd45   :  { %v541_v60 = vpack.c.bf16 %v538_v59, %v538_v59 }
 0xd47   :  { %543 = vrot.lane.b32.xlu0 %v541_v60, %s929_s11  ;;  %v803_v60 = vld [vmem:[%s1097_s5] ss:$0 sm:$0xff] }
 0xdb9   :  { %v544_v61 = vpop.permute.xlu0 %543 }
 0xdba   :  { %782 = vmatmul.msk.bf16.vlgmr.msra.gmra.mxu1 %vm60_vm0, %v544_v61 }
 0xe37   :  { %v557_v0 = vpop.f32.mrf.mxu1 }
 0xe38   :  { %v561_v1 = vadd.f32 %v557_v0, %v149_v63 }
 0xe3a   :  { %852 = vtanh.f32 %v561_v1  ;;  %v783_v4 = vmul.f32 -1.442695, %v561_v1 }
 0xe3c   :  { %854 = vpow2.f32 %v783_v4 }
 0xe3f   :  { %v559_v2 = vpop.f32.mrf.mxu1 }
 0xe40   :  { %v853_v3 = vpop.eup %852 }
 0xe41   :  { %584 = vrot.lane.b32.xlu1 %v853_v3, %s925_s29 }
 0xe42   :  { %v855_v5 = vpop.eup %854 }
 0xe43   :  { %v565_v6 = vadd.f32 1.0, %v855_v5 }
 0xe45   :  { %856 = vrcp.f32 %v565_v6  ;;  %v577_v13 = vand.u32 2147483648, %v565_v6  ;;  %vm571_vm11 = vweird.f32 %v565_v6  ;;  %v575_v14 = vand.u32 2147483647, %v565_v6 }
 0xe47   :  { %v578_v16 = vor.u32 1.1754944e-38, %v577_v13  ;;  %vm576_vm13 = vcmp.eq.f32.partialorder %v575_v14, 8.507059e+37 }
 0xe4b   :  { %v857_v7 = vpop.eup %856 }
 0xe4c   :  { %v567_v9 = vmul.f32 %v857_v7, %v565_v6  ;;  %vm572_vm10 = vweird.f32 %v857_v7 }
 0xe4d   :  { %vm573_vm12 = vmor %vm571_vm11, %vm572_vm10 }
 0xe4e   :  { %v568_v10 = vsub.f32 1.0, %v567_v9 }
 0xe50   :  { %v569_v11 = vmul.f32 %v857_v7, %v568_v10 }
 0xe52   :  { %v570_v12 = vadd.f32 %v857_v7, %v569_v11 }
 0xe54   :  { %v574_v15 = vsel %vm573_vm12, %v857_v7, %v570_v12 }
 0xe55   :  { %v579_v18 = vsel %vm576_vm13, %v578_v16, %v574_v15 }
 0xe56   :  { %v582_v20 = vmul.f32 %v579_v18, %v532_v55  ;;  %v672_v55 = vld [vmem:[%s1096_s4] sm:$0xff] }
 0xe57   :  { %697 = vmatpush.msra.mxu3 %v672_v55 }
 0xeb3   :  { %v585_v17 = vpop.permute.xlu1 %584 }
 0xeb4   :  { %v587_v19 = vmul.f32 %v585_v17, %v579_v18 }
 0xeb6   :  { %589 = vrot.lane.b32.xlu2 %v587_v19, %s929_s11 }
 0xf10   :  { %v590_v21 = vpop.permute.xlu2 %589 }
 0xf11   :  { %v592_v22 = vadd.f32 %v590_v21, %v582_v20 }
 0xf13   :  { %858 = vtanh.f32 %v592_v22 }
 0xf19   :  { %v859_v23 = vpop.eup %858 }
 0xf1a   :  { %595 = vrot.lane.b32.xlu0 %v859_v23, %s925_s29 }
 0xf8c   :  { %v596_v24 = vpop.permute.xlu0 %595 }
 0xf8d   :  { %v598_v25 = vmul.f32 %v596_v24, %v579_v18 }
 0xf8f   :  { %v601_v26 = vpack.c.bf16 %v598_v25, %v598_v25 }
 0xf91   :  { %603 = vrot.lane.b32.xlu1 %v601_v26, %s929_s11 }
0x1003   :  { %v604_v27 = vpop.permute.xlu1 %603 }
0x1004   :  { %784 = vmatmul.msk.bf16.vlgmr.msra.gmra.mxu2 %vm60_vm0, %v604_v27 }
0x1087   :  { %v617_v30 = vpop.f32.mrf.mxu2 }
0x1088   :  { %v621_v31 = vadd.f32 %v617_v30, %v151_v29 }
0x108a   :  { %860 = vtanh.f32 %v621_v31  ;;  %v785_v34 = vmul.f32 -1.442695, %v621_v31 }
0x108c   :  { %862 = vpow2.f32 %v785_v34 }
0x108f   :  { %v619_v32 = vpop.f32.mrf.mxu2 }
0x1090   :  { %v861_v33 = vpop.eup %860 }
0x1091   :  { %644 = vrot.lane.b32.xlu2 %v861_v33, %s925_s29 }
0x1092   :  { %v863_v35 = vpop.eup %862 }
0x1093   :  { %v625_v36 = vadd.f32 1.0, %v863_v35 }
0x1095   :  { %864 = vrcp.f32 %v625_v36  ;;  %v637_v42 = vand.u32 2147483648, %v625_v36  ;;  %vm631_vm15 = vweird.f32 %v625_v36  ;;  %v635_v8 = vand.u32 2147483647, %v625_v36 }
0x1097   :  { %v638_v44 = vor.u32 1.1754944e-38, %v637_v42  ;;  %vm636_vm2 = vcmp.eq.f32.partialorder %v635_v8, 8.507059e+37 }
0x109b   :  { %v865_v37 = vpop.eup %864 }
0x109c   :  { %v627_v38 = vmul.f32 %v865_v37, %v625_v36  ;;  %vm632_vm14 = vweird.f32 %v865_v37 }
0x109d   :  { %vm633_vm1 = vmor %vm631_vm15, %vm632_vm14 }
0x109e   :  { %v628_v39 = vsub.f32 1.0, %v627_v38 }
0x10a0   :  { %v629_v40 = vmul.f32 %v865_v37, %v628_v39 }
0x10a2   :  { %v630_v41 = vadd.f32 %v865_v37, %v629_v40 }
0x10a4   :  { %v634_v43 = vsel %vm633_vm1, %v865_v37, %v630_v41 }
0x10a5   :  { %v639_v46 = vsel %vm636_vm2, %v638_v44, %v634_v43 }
0x10a6   :  { %v642_v48 = vmul.f32 %v639_v46, %v592_v22 }
0x10eb   :  { %v645_v45 = vpop.permute.xlu2 %644 }
0x10ec   :  { %v647_v47 = vmul.f32 %v645_v45, %v639_v46 }
0x10ee   :  { %649 = vrot.lane.b32.xlu0 %v647_v47, %s929_s11 }
0x1160   :  { %v650_v49 = vpop.permute.xlu0 %649 }
0x1161   :  { %v652_v50 = vadd.f32 %v650_v49, %v642_v48 }
0x1163   :  { %866 = vtanh.f32 %v652_v50 }
0x1169   :  { %v867_v51 = vpop.eup %866 }
0x116a   :  { %655 = vrot.lane.b32.xlu1 %v867_v51, %s925_s29 }
0x11dc   :  { %v656_v56 = vpop.permute.xlu1 %655 }
0x11dd   :  { %v658_v57 = vmul.f32 %v656_v56, %v639_v46 }
0x11df   :  { %660 = vrot.lane.b32.xlu2 %v658_v57, %s929_s11 }
0x11e7   :  { %665 = vrot.lane.b32.xlu2 %v652_v50, %s930_s24 }
0x1239   :  { %v661_v58 = vpop.permute.xlu2 %660 }
0x123a   :  { %663 = vst.msk [vmem:[#allocation3] sm:$0xff] %vm60_vm0, %v661_v58  ;;  %786 = vmatmul.msk.f32.vlgmr.msra.gmra.mxu3 %vm60_vm0, %v661_v58 }
0x1241   :  { %v666_v59 = vpop.permute.xlu2 %665 }
0x1242   :  { %668 = vst.msk [vmem:[#allocation4] sm:$0xff] %vm60_vm0, %v666_v59 }
0x12bd   :  { %v699_v61 = vpop.f32.mrf.mxu3 }
0x12be   :  { %v700_v62 = vadd.f32 %v803_v60, %v699_v61 }
0x12c0   :  { %v703_v63 = vsel %vm702_vm3, %v700_v62, -inf }
0x12c1   :  { %704 = vmax.xlane.f32.xlu0 %v703_v63 }
0x1334   :  { %v705_v0 = vpop.xlane.xlu0 %704 }
0x1335   :  { %v706_v1 = vsub.f32 %v700_v62, %v705_v0 }
0x1337   :  { %v707_v2 = vmul.f32 1.442695, %v706_v1 }
0x1339   :  { %868 = vpow2.f32 %v707_v2 }
0x133f   :  { %v869_v3 = vpop.eup %868 }
0x1340   :  { %v709_v4 = vsel %vm702_vm3, %v869_v3, 0.0 }
0x1341   :  { %710 = vadd.xlane.f32.xlu1 %v709_v4 }
0x13b4   :  { %v711_v5 = vpop.xlane.xlu1 %710 }
0x13b5   :  { %870 = vrcp.f32 %v711_v5  ;;  %v723_v10 = vand.u32 2147483648, %v711_v5  ;;  %v721_v12 = vand.u32 2147483647, %v711_v5  ;;  %vm717_vm4 = vweird.f32 %v711_v5 }
0x13b7   :  { %v724_v14 = vor.u32 1.1754944e-38, %v723_v10  ;;  %vm722_vm6 = vcmp.eq.f32.partialorder %v721_v12, 8.507059e+37 }
0x13bb   :  { %v871_v6 = vpop.eup %870 }
0x13bc   :  { %v713_v7 = vmul.f32 %v871_v6, %v711_v5  ;;  %vm718_vm0 = vweird.f32 %v871_v6 }
0x13bd   :  { %vm719_vm5 = vmor %vm717_vm4, %vm718_vm0 }
0x13be   :  { %v714_v9 = vsub.f32 1.0, %v713_v7 }
0x13c0   :  { %v715_v11 = vmul.f32 %v871_v6, %v714_v9 }
0x13c2   :  { %v716_v13 = vadd.f32 %v871_v6, %v715_v11 }
0x13c4   :  { %v720_v15 = vsel %vm719_vm5, %v871_v6, %v716_v13 }
0x13c5   :  { %v725_v16 = vsel %vm722_vm6, %v724_v14, %v720_v15 }
0x13c6   :  { %v726_v17 = vmul.f32 %v869_v3, %v725_v16 }
0x13c8   :  { %727 = vst.msk [vmem:[%s1098_s6] sm:$0xff] %vm702_vm3, %v726_v17 }
0x13c9   :  { %732 = vsyncpa [#allocation6], 1 }
0x13ca   :  { %733 = vsyncpa [#allocation8], 1 }

</bundles_post_ra>
